<compile_context>
chip_gen: v7x
topology: tpu7x:2x2x1
jax: 0.10.0
libtpu: 0.0.40
codegen_flags: <defaults>
</compile_context>

<pallas_src>
import math

import jax
import jax.numpy as jnp
from jax.experimental import pallas as pl
from jax.experimental.pallas import tpu as pltpu


def _make_kernel(a: float, C: int):
    a2 = float(a) * float(a)  # compile-time constant baked into the kernel

    def kernel(x_ref, o_ref):
        # Tile is (TR, L); every aligned group of C consecutive lanes is one
        # sample's class vector (C divides L by construction, so groups never
        # straddle a row and the roll wrap-around is never selected).
        x = x_ref[...].astype(jnp.float32)        # nu math must stay in f32
        nu = 1.0 / (a2 * x * x + 1e-20)
        if C > 1:
            L = nu.shape[-1]
            # Position of each lane inside its group of C.
            pos = jax.lax.broadcasted_iota(jnp.int32, nu.shape, 1) % C
            denom = nu
            for d in range(1, C):
                fwd = pltpu.roll(nu, shift=d, axis=1)            # lane k <- nu[k-d]
                bwd = pltpu.roll(nu, shift=(d - C) % L, axis=1)  # lane k <- nu[k+C-d]
                # Group member d positions before k if it exists, otherwise
                # the member C-d positions after k (still inside the group).
                denom = denom + jnp.where(pos >= d, fwd, bwd)
        else:
            denom = nu
        o_ref[...] = (nu * pl.reciprocal(denom, approx=True)).astype(o_ref.dtype)

    return kernel


def _vmem_limit_bytes() -> int:
    try:
        cap = pltpu.get_tpu_info().vmem_capacity_bytes
    except Exception:
        cap = 64 << 20                       # v7x-safe fallback
    return int(min(cap // 2, 64 << 20))      # 64 MiB on v5e/v6e, 32 MiB on v7x


def _pick_lane_width(C: int) -> int:
    # Lane width must be a multiple of 128 (vreg lanes) and of C (groups stay
    # inside a row); grow to >= 512 lanes for dense, unmasked stores.
    base = (C * 128) // math.gcd(C, 128)     # lcm(C, 128)
    return base * max(1, -(-512 // base))


def _pick_block_rows(R: int, L: int, itemsize: int, vmem_limit: int) -> int:
    if R <= 8:
        return R
    # Resident VMEM per block row: double-buffered input + output tiles in the
    # native dtype plus ~6 f32-sized compute temporaries (conservative).
    per_row = L * (4 * itemsize + 6 * 4)
    tr_vmem = (3 * vmem_limit // 4) // max(per_row, 1)
    tr_dma = (4 << 20) // (L * itemsize)     # ~4 MiB of input DMA per grid step
    tr = max(8, min(tr_vmem, tr_dma))
    tr = (tr // 8) * 8
    if tr >= R:
        # Keep at least 2 grid steps so both v7x TensorCores get work.
        tr = max(8, ((R // 2 + 7) // 8) * 8)
    return min(tr, R)


def conservative_softmax(x: jax.Array, a: float, *, lane_width=None,
                         block_rows=None) -> jax.Array:
    """x: [B, C] float array.  Returns [B, C] of the same dtype."""
    B, C = x.shape
    itemsize = jnp.dtype(x.dtype).itemsize
    L = int(lane_width) if lane_width is not None else _pick_lane_width(C)
    assert L % 128 == 0 and L % C == 0, "lane_width must be a multiple of 128 and C"

    # Pad whole rows (so groups of C stay intact) until the flat length divides
    # L, then take a zero-copy [R, L] view of the contiguous [B, C] buffer.
    rows_per_line = L // C
    pad_rows = (-B) % rows_per_line
    xp = x if pad_rows == 0 else jnp.pad(x, ((0, pad_rows), (0, 0)),
                                         constant_values=1)
    Bp = B + pad_rows
    R = (Bp * C) // L
    x_flat = xp.reshape(R, L)

    vmem_limit = _vmem_limit_bytes()
    tr = (int(block_rows) if block_rows is not None
          else _pick_block_rows(R, L, itemsize, vmem_limit))
    tr = min(tr, R)

    n = B * C
    out_flat = pl.pallas_call(
        _make_kernel(a, C),
        out_shape=jax.ShapeDtypeStruct((R, L), x.dtype),
        grid=(pl.cdiv(R, tr),),
        in_specs=[pl.BlockSpec((tr, L), lambda i: (i, 0))],
        out_specs=pl.BlockSpec((tr, L), lambda i: (i, 0)),
        compiler_params=pltpu.CompilerParams(
            dimension_semantics=("parallel",),
            vmem_limit_bytes=vmem_limit,
        ),
        cost_estimate=pl.CostEstimate(
            flops=(6 + 4 * C) * n,
            transcendentals=2 * n,
            bytes_accessed=2 * n * itemsize,
        ),
    )(x_flat)

    out = out_flat.reshape(Bp, C)
    return out if pad_rows == 0 else out[:B]


def conservative_softmax_ref(x: jax.Array, a: float) -> jax.Array:
    xf = x.astype(jnp.float32)
    nu = 1.0 / ((a * xf) ** 2 + 1e-20)
    return (nu / jnp.sum(nu, axis=1, keepdims=True)).astype(x.dtype)


if __name__ == "__main__":
    a = 0.5
    num_classes = 4  # module has no weights; a / num_classes are hyper-params

    # Small shape consistent with the module: input is [batch, num_classes].
    B = 256
    x = jax.random.normal(jax.random.PRNGKey(0), (B, num_classes),
                          dtype=jnp.float32)
    ref = conservative_softmax_ref(x, a)
    out = jax.block_until_ready(conservative_softmax(x, a))
    assert out.shape == (B, num_classes)
    # Tolerance loosened for the approximate EUP reciprocal on the denominator.
    assert jnp.allclose(out, ref, atol=5e-3, rtol=5e-3), "mismatch vs reference"

    # Larger batch to exercise the multi-step (pipelined / megacore-shardable)
    # grid, both auto-sized and with a forced small block.
    B2 = 4096
    x2 = jax.random.normal(jax.random.PRNGKey(1), (B2, num_classes),
                           dtype=jnp.float32)
    ref2 = conservative_softmax_ref(x2, a)
    out2 = jax.block_until_ready(conservative_softmax(x2, a))
    out2b = jax.block_until_ready(conservative_softmax(x2, a, block_rows=8))
    assert jnp.allclose(out2, ref2, atol=5e-3, rtol=5e-3), "auto-tiled mismatch"
    assert jnp.allclose(out2b, ref2, atol=5e-3, rtol=5e-3), "forced-tiled mismatch"

    # Batch that needs row padding (B*C not a multiple of the lane width).
    B3 = 100
    x3 = jax.random.normal(jax.random.PRNGKey(2), (B3, num_classes),
                           dtype=jnp.float32)
    ref3 = conservative_softmax_ref(x3, a)
    out3 = jax.block_until_ready(conservative_softmax(x3, a))
    assert jnp.allclose(out3, ref3, atol=5e-3, rtol=5e-3), "padded mismatch"

    print("KERNEL_OK")
</pallas_src>

<mosaic_0001>
module attributes {stable_mosaic.version = 11 : i64} {
  func.func @kernel(%arg0: i32, %arg1: memref<2x512xf32, #tpu.memory_space<vmem>>, %arg2: memref<2x512xf32, #tpu.memory_space<vmem>>) attributes {dimension_semantics = [#tpu.dimension_semantics<parallel>], iteration_bounds = array<i64: 1>, scalar_prefetch = 0 : i64, scratch_operands = 0 : i64, tpu.core_type = #tpu.core_type<tc>, window_params = [{transform_indices = @transform_0, window_bounds = array<i64: 2, 512>}, {transform_indices = @transform_1, window_bounds = array<i64: 2, 512>}]} {
    %c0 = arith.constant 0 : index
    %c0_0 = arith.constant 0 : index
    %0 = vector.load %arg1[%c0, %c0_0] : memref<2x512xf32, #tpu.memory_space<vmem>>, vector<2x512xf32>
    %cst = arith.constant 2.500000e-01 : f32
    %1 = vector.broadcast %cst : f32 to vector<2x512xf32>
    %2 = arith.mulf %1, %0 : vector<2x512xf32>
    %3 = arith.mulf %2, %0 : vector<2x512xf32>
    %cst_1 = arith.constant 9.99999968E-21 : f32
    %4 = vector.broadcast %cst_1 : f32 to vector<2x512xf32>
    %5 = arith.addf %3, %4 : vector<2x512xf32>
    %cst_2 = arith.constant 1.000000e+00 : f32
    %6 = vector.broadcast %cst_2 : f32 to vector<2x512xf32>
    %7 = arith.divf %6, %5 : vector<2x512xf32>
    %8 = tpu.iota {dimensions = array<i32: 1>} : vector<2x512xi32>
    %c4_i32 = arith.constant 4 : i32
    %c0_i32 = arith.constant 0 : i32
    %9 = arith.cmpi eq, %c4_i32, %c0_i32 : i32
    %c1_i32 = arith.constant 1 : i32
    %10 = arith.select %9, %c1_i32, %c4_i32 : i32
    %11 = vector.broadcast %10 : i32 to vector<2x512xi32>
    %12 = arith.remsi %8, %11 : vector<2x512xi32>
    %c0_i32_3 = arith.constant 0 : i32
    %13 = vector.broadcast %c0_i32_3 : i32 to vector<2x512xi32>
    %14 = arith.cmpi ne, %12, %13 : vector<2x512xi32>
    %c0_i32_4 = arith.constant 0 : i32
    %15 = vector.broadcast %c0_i32_4 : i32 to vector<2x512xi32>
    %16 = arith.cmpi slt, %12, %15 : vector<2x512xi32>
    %c0_i32_5 = arith.constant 0 : i32
    %17 = arith.cmpi slt, %10, %c0_i32_5 : i32
    %18 = vector.broadcast %17 : i1 to vector<2x512xi1>
    %19 = vector.broadcast %18 : vector<2x512xi1> to vector<2x512xi1>
    %20 = arith.xori %16, %19 : vector<2x512xi1>
    %21 = arith.andi %20, %14 : vector<2x512xi1>
    %22 = vector.broadcast %10 : i32 to vector<2x512xi32>
    %23 = arith.addi %12, %22 : vector<2x512xi32>
    %24 = arith.select %21, %23, %12 : vector<2x512xi1>, vector<2x512xi32>
    %c1_i32_6 = arith.constant 1 : i32
    %25 = tpu.dynamic_rotate %7 by %c1_i32_6 dim 1 : vector<2x512xf32>, i32 -> vector<2x512xf32>
    %c509_i32 = arith.constant 509 : i32
    %26 = tpu.dynamic_rotate %7 by %c509_i32 dim 1 : vector<2x512xf32>, i32 -> vector<2x512xf32>
    %c1_i32_7 = arith.constant 1 : i32
    %27 = vector.broadcast %c1_i32_7 : i32 to vector<2x512xi32>
    %28 = arith.cmpi sge, %24, %27 : vector<2x512xi32>
    %29 = arith.select %28, %25, %26 : vector<2x512xi1>, vector<2x512xf32>
    %30 = arith.addf %7, %29 : vector<2x512xf32>
    %c2_i32 = arith.constant 2 : i32
    %31 = tpu.dynamic_rotate %7 by %c2_i32 dim 1 : vector<2x512xf32>, i32 -> vector<2x512xf32>
    %c510_i32 = arith.constant 510 : i32
    %32 = tpu.dynamic_rotate %7 by %c510_i32 dim 1 : vector<2x512xf32>, i32 -> vector<2x512xf32>
    %c2_i32_8 = arith.constant 2 : i32
    %33 = vector.broadcast %c2_i32_8 : i32 to vector<2x512xi32>
    %34 = arith.cmpi sge, %24, %33 : vector<2x512xi32>
    %35 = arith.select %34, %31, %32 : vector<2x512xi1>, vector<2x512xf32>
    %36 = arith.addf %30, %35 : vector<2x512xf32>
    %c3_i32 = arith.constant 3 : i32
    %37 = tpu.dynamic_rotate %7 by %c3_i32 dim 1 : vector<2x512xf32>, i32 -> vector<2x512xf32>
    %c511_i32 = arith.constant 511 : i32
    %38 = tpu.dynamic_rotate %7 by %c511_i32 dim 1 : vector<2x512xf32>, i32 -> vector<2x512xf32>
    %c3_i32_9 = arith.constant 3 : i32
    %39 = vector.broadcast %c3_i32_9 : i32 to vector<2x512xi32>
    %40 = arith.cmpi sge, %24, %39 : vector<2x512xi32>
    %41 = arith.select %40, %37, %38 : vector<2x512xi1>, vector<2x512xf32>
    %42 = arith.addf %36, %41 : vector<2x512xf32>
    %43 = tpu.reciprocal %42 {approx = true} : vector<2x512xf32> -> vector<2x512xf32>
    %44 = arith.mulf %7, %43 : vector<2x512xf32>
    %c0_10 = arith.constant 0 : index
    %c0_11 = arith.constant 0 : index
    %45 = vector.load %arg2[%c0_10, %c0_11] : memref<2x512xf32, #tpu.memory_space<vmem>>, vector<2x512xf32>
    tpu.vector_store %arg2[%c0_10, %c0_11], %44 {strides = array<i32>} : memref<2x512xf32, #tpu.memory_space<vmem>>, vector<2x512xf32>,
    return
  }
  func.func @transform_0(%arg0: i32) -> (i32, i32) {
    %c0_i32 = arith.constant 0 : i32
    %c0_i32_0 = arith.constant 0 : i32
    return %arg0, %c0_i32 : i32, i32
  }
  func.func @transform_1(%arg0: i32) -> (i32, i32) {
    %c0_i32 = arith.constant 0 : i32
    %c0_i32_0 = arith.constant 0 : i32
    return %arg0, %c0_i32 : i32, i32
  }
}

</mosaic_0001>

<bundles_post_ra>
// kernel: tpu_custom_call.1
= control target key start
LH: loop header
LB: loop body
LE: loop exit
PB: predicated region body
PF: predicated region fallthrough
CT: control target
= control target key end

     0   :  { %6 = vsyncpa [#allocation3], 0  ;;  %s498_s0 = inlined_call_operand.hbm [shape: f32[2,512], index: 0, kind: input, shape index: {}]   ;;  %s499_s1 = inlined_call_operand.hbm [shape: f32[2,512], index: 1, kind: output, shape index: {}]  }
   0x1   :  { %7 = vsyncpa [#allocation4], 0  ;;  %s352_s6 = smov [#allocation2]   ;;  %s304_s10 = scalar_lea.hbm %s498_s0, 128 }
   0x2   :  { %s14_s7 = sshll.u32 %s352_s6, 4  ;;  %p305_p0 = scmp.ne.s32.totalorder %s498_s0, %s304_s10  ;;  %s15_s7 = int_to_ptr.vmem [resolvable:$true] %s14_s7 }
   0x3   :  { %p308_p1 = scmp.lt.u32.totalorder %s304_s10, %s498_s0 }
   0x5   :  { %p310_p2 = pnand %p308_p1, %p305_p0 }
   0x7   :  { %313 = shalt.err (!%p310_p2)
}
   0x8   :  { %s314_s15 = scalar_lea.vmem %s15_s7, 128  ;;  %p319_p4 = scmp.lt.s32.totalorder %s15_s7, %s15_s7 }
   0x9   :  { %p315_p3 = scmp.ne.s32.totalorder %s15_s7, %s314_s15  ;;  %p320_p5 = scmp.lt.s32.totalorder %s314_s15, %s314_s15 }
   0xb   :  { %p321_p6 = por %p320_p5, %p319_p4 }
   0xd   :  { %p322_p7 = pnand %p321_p6, %p315_p3 }
   0xf   :  { %325 = shalt.err (!%p322_p7)
}
  0x10   :  { %17 = dma.hbm_to_vmem [thread:$0]  %s498_s0, 128, %s15_s7, [#allocation3]  }
  0x11   :  { %348 = dma.done.wait [#allocation3], 128  }
  0x12   :  { %349 = vsyncadd [#allocation3], 4294967168  ;;  %v21_v0 = vld [vmem:[#allocation2] sm:$0xff]  ;;  %v27_v4 = vlaneseq  ;;  %v353_v5 = vmov 1983009808   ;;  %s354_s0 = smov 1  }
  0x13   :  { %v22_v1 = vmul.f32 0.25, %v21_v0  ;;  %v83_v6 = vunpack.c.l.s4 %v353_v5  ;;  %s355_s18 = smov 125   ;;  %s356_s19 = smov 2  }
  0x14   :  { %v86_v8 = vshrl.u32 %v27_v4, 7  ;;  %s357_s20 = smov 126   ;;  %s358_s21 = smov 3   ;;  %v392_v26 = vand.u32 127, %v27_v4 }
  0x15   :  { %v23_v2 = vmul.f32 %v22_v1, %v21_v0  ;;  %v84_v7 = vunpack.c.0.s8 %v83_v6  ;;  %s359_s22 = smov 127   ;;  %s360_s23 = smov [#allocation5]  }
  0x16   :  { %v30_v28 = vadd.s32 256, %v392_v26  ;;  %v31_v29 = vadd.s32 384, %v392_v26  ;;  %v29_v31 = vadd.s32 128, %v392_v26  ;;  %vm123_vm0 = vcmp.lt.s32.totalorder %v392_v26, 125  ;;  %s282_s24 = sshll.u32 %s360_s23, 4  ;;  %s283_s24 = int_to_ptr.vmem [resolvable:$true] %s282_s24 }
  0x17   :  { %v24_v3 = vadd.f32 1e-20, %v23_v2  ;;  %v383_v9 = vsub.s32 %v84_v7, %v86_v8  ;;  %vm110_vm1 = vcmp.lt.s32.totalorder %v392_v26, 1  ;;  %v406_v38 = vand.u32 3, %v392_v26  ;;  %s326_s25 = scalar_lea.vmem %s283_s24, 128  ;;  %p331_p9 = scmp.lt.s32.totalorder %s283_s24, %s283_s24 }
  0x18   :  { %v397_v33 = vand.u32 3, %v30_v28  ;;  %v399_v34 = vand.u32 3, %v31_v29  ;;  %v401_v36 = vand.u32 3, %v29_v31  ;;  %vm167_vm4 = vcmp.lt.s32.totalorder %v392_v26, 2  ;;  %p327_p8 = scmp.ne.s32.totalorder %s283_s24, %s326_s25  ;;  %p332_p10 = scmp.lt.s32.totalorder %s326_s25, %s326_s25 }
  0x19   :  { %300 = vrcp.f32 %v24_v3  ;;  %vm180_vm6 = vcmp.lt.s32.totalorder %v392_v26, 126  ;;  %vm128_vm7 = vcmp.ge.s32.totalorder %v406_v38, 1  ;;  %vm185_vm8 = vcmp.ge.s32.totalorder %v406_v38, 2 }
  0x1a   :  { %vm130_vm2 = vcmp.ge.s32.totalorder %v397_v33, 1  ;;  %vm131_vm3 = vcmp.ge.s32.totalorder %v399_v34, 1  ;;  %vm129_vm5 = vcmp.ge.s32.totalorder %v401_v36, 1  ;;  %vm187_vm9 = vcmp.ge.s32.totalorder %v397_v33, 2  ;;  %p333_p11 = por %p332_p10, %p331_p9 }
  0x1b   :  { %vm188_vm10 = vcmp.ge.s32.totalorder %v399_v34, 2  ;;  %vm186_vm11 = vcmp.ge.s32.totalorder %v401_v36, 2  ;;  %vm237_vm12 = vcmp.lt.s32.totalorder %v392_v26, 127  ;;  %vm224_vm13 = vcmp.lt.s32.totalorder %v392_v26, 3 }
  0x1c   :  { %vm242_vm14 = vcmp.ge.s32.totalorder %v406_v38, 3  ;;  %vm243_vm15 = vcmp.ge.s32.totalorder %v401_v36, 3  ;;  %p334_p12 = pnand %p333_p11, %p327_p8 }
  0x23   :  { %v385_v10 = vpop.eup %300 }
  0x24   :  { %v88_v11 = vrot.slane %v385_v10, %v383_v9  ;;  %v81_v12 = vcombine.high %v385_v10, %v385_v10 }
  0x26   :  { %102 = vrot.lane.b32.xlu0 %v88_v11, %s354_s0  ;;  %v95_v13 = vrot.slane %v81_v12, %v383_v9  ;;  %v96_v14 = vcombine.high %v88_v11, %v88_v11 }
  0x28   :  { %106 = vrot.lane.b32.xlu1 %v95_v13, %s354_s0  ;;  %v97_v15 = vcombine.high %v95_v13, %v95_v13 }
  0x2a   :  { %115 = vrot.lane.b32.xlu0 %v88_v11, %s355_s18 }
  0x2c   :  { %117 = vrot.lane.b32.xlu1 %v96_v14, %s355_s18 }
  0x2e   :  { %159 = vrot.lane.b32.xlu0 %v88_v11, %s356_s19 }
  0x30   :  { %161 = vrot.lane.b32.xlu1 %v96_v14, %s356_s19 }
  0x32   :  { %172 = vrot.lane.b32.xlu0 %v88_v11, %s357_s20 }
  0x34   :  { %174 = vrot.lane.b32.xlu1 %v96_v14, %s357_s20 }
  0x36   :  { %104 = vrot.lane.b32.xlu0 %v96_v14, %s354_s0 }
  0x38   :  { %108 = vrot.lane.b32.xlu1 %v97_v15, %s354_s0 }
  0x3a   :  { %119 = vrot.lane.b32.xlu0 %v95_v13, %s355_s18 }
  0x3c   :  { %121 = vrot.lane.b32.xlu1 %v97_v15, %s355_s18 }
  0x3e   :  { %163 = vrot.lane.b32.xlu0 %v95_v13, %s356_s19 }
  0x40   :  { %165 = vrot.lane.b32.xlu1 %v97_v15, %s356_s19 }
  0x42   :  { %176 = vrot.lane.b32.xlu0 %v95_v13, %s357_s20 }
  0x44   :  { %178 = vrot.lane.b32.xlu1 %v97_v15, %s357_s20 }
  0x46   :  { %216 = vrot.lane.b32.xlu0 %v88_v11, %s358_s21 }
  0x48   :  { %218 = vrot.lane.b32.xlu1 %v96_v14, %s358_s21 }
  0x4a   :  { %220 = vrot.lane.b32.xlu0 %v95_v13, %s358_s21 }
  0x4c   :  { %222 = vrot.lane.b32.xlu1 %v97_v15, %s358_s21 }
  0x4e   :  { %229 = vrot.lane.b32.xlu0 %v88_v11, %s359_s22 }
  0x50   :  { %231 = vrot.lane.b32.xlu1 %v96_v14, %s359_s22 }
  0x52   :  { %233 = vrot.lane.b32.xlu0 %v95_v13, %s359_s22 }
  0x54   :  { %235 = vrot.lane.b32.xlu1 %v97_v15, %s359_s22 }
  0x98   :  { %v103_v16 = vpop.permute.xlu0 %102 }
  0x9a   :  { %v107_v17 = vpop.permute.xlu1 %106 }
  0x9c   :  { %v116_v18 = vpop.permute.xlu0 %115 }
  0x9e   :  { %v118_v19 = vpop.permute.xlu1 %117 }
  0x9f   :  { %v126_v54 = vsel %vm123_vm0, %v116_v18, %v118_v19 }
  0xa0   :  { %v160_v20 = vpop.permute.xlu0 %159 }
  0xa2   :  { %v162_v21 = vpop.permute.xlu1 %161 }
  0xa3   :  { %v170_v58 = vsel %vm167_vm4, %v160_v20, %v162_v21 }
  0xa4   :  { %v173_v22 = vpop.permute.xlu0 %172 }
  0xa6   :  { %v175_v23 = vpop.permute.xlu1 %174 }
  0xa7   :  { %v183_v4 = vsel %vm180_vm6, %v173_v22, %v175_v23 }
  0xa8   :  { %v105_v24 = vpop.permute.xlu0 %104 }
  0xa9   :  { %v112_v42 = vsel %vm110_vm1, %v105_v24, %v107_v17  ;;  %v113_v48 = vsel %vm110_vm1, %v103_v16, %v105_v24 }
  0xaa   :  { %v109_v25 = vpop.permute.xlu1 %108 }
  0xab   :  { %v111_v43 = vsel %vm110_vm1, %v107_v17, %v109_v25  ;;  %v114_v49 = vsel %vm110_vm1, %v109_v25, %v103_v16  ;;  %vm245_vm1 = vcmp.ge.s32.totalorder %v399_v34, 3 }
  0xac   :  { %v120_v27 = vpop.permute.xlu0 %119  ;;  %v132_v59 = vsel %vm128_vm7, %v114_v49, %v126_v54 }
  0xad   :  { %v125_v44 = vsel %vm123_vm0, %v118_v19, %v120_v27 }
  0xae   :  { %v122_v30 = vpop.permute.xlu1 %121  ;;  %v133_v51 = vsel %vm129_vm5, %v113_v48, %v125_v44 }
  0xaf   :  { %v124_v39 = vsel %vm123_vm0, %v120_v27, %v122_v30  ;;  %v127_v40 = vsel %vm123_vm0, %v122_v30, %v116_v18  ;;  %v140_v62 = vcombine.low %v132_v59, %v133_v51  ;;  %vm244_vm0 = vcmp.ge.s32.totalorder %v397_v33, 3 }
  0xb0   :  { %v164_v32 = vpop.permute.xlu0 %163  ;;  %v134_v46 = vsel %vm130_vm2, %v112_v42, %v124_v39  ;;  %v135_v47 = vsel %vm131_vm3, %v111_v43, %v127_v40 }
  0xb1   :  { %v141_v55 = vcombine.low %v134_v46, %v135_v47  ;;  %v169_v60 = vsel %vm167_vm4, %v162_v21, %v164_v32  ;;  %v148_v11 = vrot.slane %v140_v62, %v383_v9 }
  0xb2   :  { %v166_v35 = vpop.permute.xlu1 %165 }
  0xb3   :  { %v168_v61 = vsel %vm167_vm4, %v164_v32, %v166_v35  ;;  %v171_v63 = vsel %vm167_vm4, %v166_v35, %v160_v20  ;;  %v155_v5 = vrot.slane %v141_v55, %v383_v9 }
  0xb4   :  { %v177_v37 = vpop.permute.xlu0 %176  ;;  %v189_v7 = vsel %vm185_vm8, %v171_v63, %v183_v4 }
  0xb5   :  { %v182_v56 = vsel %vm180_vm6, %v175_v23, %v177_v37  ;;  %v156_v15 = vcombine.low %v148_v11, %v155_v5 }
  0xb6   :  { %v179_v41 = vpop.permute.xlu1 %178  ;;  %v190_v3 = vsel %vm186_vm11, %v170_v58, %v182_v56 }
  0xb7   :  { %v181_v52 = vsel %vm180_vm6, %v177_v37, %v179_v41  ;;  %v184_v53 = vsel %vm180_vm6, %v179_v41, %v173_v22  ;;  %v197_v12 = vcombine.low %v189_v7, %v190_v3  ;;  %v158_v35 = vadd.f32 %v385_v10, %v156_v15 }
  0xb8   :  { %v217_v45 = vpop.permute.xlu0 %216  ;;  %v191_v0 = vsel %vm187_vm9, %v169_v60, %v181_v52  ;;  %v192_v1 = vsel %vm188_vm10, %v168_v61, %v184_v53 }
  0xb9   :  { %v198_v8 = vcombine.low %v191_v0, %v192_v1  ;;  %v205_v21 = vrot.slane %v197_v12, %v383_v9 }
  0xba   :  { %v219_v50 = vpop.permute.xlu1 %218 }
  0xbb   :  { %v212_v17 = vrot.slane %v198_v8, %v383_v9  ;;  %v227_v18 = vsel %vm224_vm13, %v217_v45, %v219_v50 }
  0xbc   :  { %v221_v57 = vpop.permute.xlu0 %220 }
  0xbd   :  { %v226_v22 = vsel %vm224_vm13, %v219_v50, %v221_v57  ;;  %v213_v33 = vcombine.low %v205_v21, %v212_v17 }
  0xbe   :  { %v223_v2 = vpop.permute.xlu1 %222 }
  0xbf   :  { %v228_v19 = vsel %vm224_vm13, %v223_v2, %v217_v45  ;;  %v225_v27 = vsel %vm224_vm13, %v221_v57, %v223_v2  ;;  %v215_v38 = vadd.f32 %v213_v33, %v158_v35 }
  0xc0   :  { %v230_v6 = vpop.permute.xlu0 %229 }
  0xc2   :  { %v232_v13 = vpop.permute.xlu1 %231 }
  0xc3   :  { %v240_v14 = vsel %vm237_vm12, %v230_v6, %v232_v13 }
  0xc4   :  { %v234_v16 = vpop.permute.xlu0 %233  ;;  %v246_v23 = vsel %vm242_vm14, %v228_v19, %v240_v14 }
  0xc5   :  { %v239_v20 = vsel %vm237_vm12, %v232_v13, %v234_v16 }
  0xc6   :  { %v247_v24 = vsel %vm243_vm15, %v227_v18, %v239_v20  ;;  %v236_v25 = vpop.permute.xlu1 %235 }
  0xc7   :  { %v254_v28 = vcombine.low %v246_v23, %v247_v24  ;;  %v238_v29 = vsel %vm237_vm12, %v234_v16, %v236_v25  ;;  %v241_v30 = vsel %vm237_vm12, %v236_v25, %v230_v6 }
  0xc8   :  { %v248_v31 = vsel %vm244_vm0, %v226_v22, %v238_v29  ;;  %v249_v32 = vsel %vm245_vm1, %v225_v27, %v241_v30 }
  0xc9   :  { %v255_v34 = vcombine.low %v248_v31, %v249_v32  ;;  %v262_v36 = vrot.slane %v254_v28, %v383_v9 }
  0xcb   :  { %v269_v37 = vrot.slane %v255_v34, %v383_v9 }
  0xcd   :  { %v270_v39 = vcombine.low %v262_v36, %v269_v37 }
  0xcf   :  { %v272_v40 = vadd.f32 %v270_v39, %v215_v38 }
  0xd1   :  { %302 = vrcp.f32 %v272_v40 }
  0xdb   :  { %v303_v41 = vpop.eup %302 }
  0xdc   :  { %v274_v26 = vmul.f32 %v303_v41, %v385_v10 }
  0xde   :  { %275 = vst [vmem:[#allocation5] sm:$0xff] %v274_v26 }
  0xdf   :  { %337 = shalt.err (!%p334_p12)
}
  0xe0   :  { %s338_s28 = scalar_lea.hbm %s499_s1, 128 }
  0xe1   :  { %p339_p13 = scmp.ne.s32.totalorder %s499_s1, %s338_s28  ;;  %p342_p0 = scmp.lt.u32.totalorder %s338_s28, %s499_s1 }
  0xe3   :  { %p344_p1 = pnand %p342_p0, %p339_p13 }
  0xe5   :  { %347 = shalt.err (!%p344_p1)
}
  0xe6   :  { %285 = dma.vmem_to_hbm [thread:$0]  %s283_s24, 128, %s499_s1, [#allocation4]  }
  0xe7   :  { %350 = dma.done.wait [#allocation4], 128  }
  0xe8   :  { %351 = vsyncadd [#allocation4], 4294967168 }
  0xe9   :  { %289 = vsyncpa [#allocation3], 1 }
  0xea   :  { %290 = vsyncpa [#allocation4], 1 }

</bundles_post_ra>
